<compile_context>
chip_gen: v7x
topology: tpu7x:2x2x1
jax: 0.10.0
libtpu: 0.0.40
codegen_flags: <defaults>
</compile_context>

<pallas_src>
import functools

import jax
import jax.numpy as jnp
from jax.experimental import pallas as pl
from jax.experimental.pallas import tpu as pltpu

# bf16 operands for the MXU 1x1-conv matmuls (f32 accumulation).
_MXU_DTYPE = jnp.bfloat16

# Max lane width of a 1x1-conv matmul group (v6e/v7x MXU width).
_LANE_GROUP_CAP = 256

# Conservative VMEM budget for the pipelined x/out blocks (v7x: 64 MiB physical).
_VMEM_BUDGET = 40 << 20

# Named row offsets inside the packed per-channel vector block.
ROW_SB1_S, ROW_SB1_B = 0, 1          # conv1 folded BN scale / bias (W-tiled)
ROW_SB2_S, ROW_SB2_B = 2, 3          # conv2 folded BN scale / bias
ROW_SB3_S, ROW_SB3_B = 4, 5          # conv3 folded BN scale / bias
ROW_DW0 = 6                          # 9 depthwise taps at ROW_DW0 + (dy+1)*3 + (dx+1)
ROW_BSE1 = 15                        # SE FC1 bias (first c//2 lanes, zero padded)
ROW_BSE2 = 16                        # SE FC2 bias (W-tiled)
ROW_WSE2 = 17                        # c//2 rows of SE FC2 weight (each W-tiled)


def _se_branch_kernel(x_ref, w1_ref, w3_ref, vec_ref, wse1_ref, o_ref, *, c):
    """conv1(1x1)+BN+ReLU -> conv2(3x3 dw)+BN -> conv3(1x1)+BN+ReLU -> SE.

    Layout: (N_blk, H, W*c), channels minor inside each group of c lanes.
    """
    nb, h, wc = x_ref.shape
    m = nb * h
    gwc = w1_ref.shape[0]            # capped lane-group width for the 1x1 matmuls
    ng = wc // gwc

    vec = vec_ref[...]               # (ROW_WSE2 + c//2, W*c) packed rows, f32
    x = x_ref[...].reshape(m, wc)

    def conv1x1_bn_relu(v, w_ref, s_row, b_row):
        # 1x1 conv over lane groups of gwc lanes as block-diagonal bf16 MXU
        # matmuls (f32 accumulation), then folded BN + ReLU (f32 VPU).
        # TODO(synk): for c >= 128, a dense (c, c) matmul on a (m*W, c) reshape
        # (W moved to sublanes) would avoid the zero-block MXU waste entirely.
        parts = []
        for q in range(ng):
            xs = v if ng == 1 else v[:, q * gwc:(q + 1) * gwc]
            parts.append(jnp.dot(xs.astype(w_ref.dtype), w_ref[...],
                                 preferred_element_type=jnp.float32))
        out = parts[0] if ng == 1 else jnp.concatenate(parts, axis=1)
        return jnp.maximum(out * vec[s_row] + vec[b_row], 0.0)

    # ---- conv1: 1x1 conv + BN + ReLU ----------------------------------------
    y = conv1x1_bn_relu(x, w1_ref, ROW_SB1_S, ROW_SB1_B)          # (m, W*c) f32

    # ---- conv2: 3x3 depthwise (padding=1) via XLU rolls + boundary masks ----
    # Horizontal pass: 2 lane rolls shared by all three dy taps.
    lane = jax.lax.broadcasted_iota(jnp.int32, (1, wc), 1)
    ok_l = (lane >= c).astype(jnp.float32)            # w-1 neighbour exists
    ok_r = (lane < wc - c).astype(jnp.float32)        # w+1 neighbour exists
    y_l = pltpu.roll(y, shift=c, axis=1) * ok_l       # value at (r, w-1)
    y_r = pltpu.roll(y, shift=wc - c, axis=1) * ok_r  # value at (r, w+1)

    tap = lambda dy, dx: vec[ROW_DW0 + (dy + 1) * 3 + (dx + 1)]
    hsum = [tap(dy, -1) * y_l + tap(dy, 0) * y + tap(dy, 1) * y_r
            for dy in (-1, 0, 1)]

    # Vertical pass: 2 sublane rolls; row masks stop wrap-around across image
    # boundaries inside the folded batch block.
    # TODO(synk): at production H, stage y in a VMEM scratch and read rows at
    # static offsets instead of whole-array sublane rolls (vreg pressure).
    row = jax.lax.broadcasted_iota(jnp.int32, (nb, h, 1), 1).reshape(m, 1)
    ok_u = (row >= 1).astype(jnp.float32)             # r-1 in same image
    ok_d = (row < h - 1).astype(jnp.float32)          # r+1 in same image
    acc = hsum[1]
    acc = acc + pltpu.roll(hsum[0], shift=1, axis=0) * ok_u       # dy = -1
    acc = acc + pltpu.roll(hsum[2], shift=m - 1, axis=0) * ok_d   # dy = +1
    y = acc * vec[ROW_SB2_S] + vec[ROW_SB2_B]         # folded BN (no ReLU)

    # ---- conv3: 1x1 conv + BN + ReLU ----------------------------------------
    z = conv1x1_bn_relu(y, w3_ref, ROW_SB3_S, ROW_SB3_B)          # (m, W*c) f32

    # ---- SE: pool -> FC1 -> ReLU -> FC2 -> sigmoid -> scale ------------------
    # 1/(H*W) pool factor is folded into wse1_ref; the broadcast of the
    # per-channel gate back over W is folded into the W-tiled FC2 rows in vec.
    colsum = jnp.sum(z.reshape(nb, h, wc), axis=1)                # (nb, W*c)
    s = jnp.dot(colsum, wse1_ref[...], preferred_element_type=jnp.float32)
    s = jnp.maximum(s + vec[ROW_BSE1, :c // 2], 0.0)              # (nb, c//2)
    if c // 2 <= 8:
        logits = vec[ROW_BSE2]                        # tiny FC2 on the VPU
        for k in range(c // 2):
            logits = logits + s[:, k:k + 1] * vec[ROW_WSE2 + k]
    else:
        logits = jnp.dot(s, vec[ROW_WSE2:ROW_WSE2 + c // 2],
                         preferred_element_type=jnp.float32) + vec[ROW_BSE2]
    gate = jax.nn.sigmoid(logits)                                 # (nb, W*c)

    o_ref[...] = (z.reshape(nb, h, wc) * gate[:, None, :]).astype(o_ref.dtype)


# ---------------------------------------------------------------------------
# Wrapper / parameter packing
# ---------------------------------------------------------------------------
def _block_diag_1x1(w_io, group):
    """(c, c) 1x1-conv weight (in, out) -> (group*c, group*c) block-diagonal."""
    c = w_io.shape[0]
    eye = jnp.eye(group, dtype=w_io.dtype)
    return jnp.einsum("wv,io->wivo", eye, w_io).reshape(group * c, group * c)


def _lane_group(w_spatial, c):
    """Largest divisor g of W with g*c <= 256 (at least 1)."""
    g = max(1, min(w_spatial, _LANE_GROUP_CAP // max(c, 1)))
    while w_spatial % g:
        g -= 1
    return g


def _pack_branch_params(p, c, w_spatial, h_spatial, lane_group):
    wc = w_spatial * c
    tile = lambda v: jnp.tile(v.reshape(-1), w_spatial)          # (c,) -> (W*c,)
    w1bd = _block_diag_1x1(p["w1"], lane_group).astype(_MXU_DTYPE)
    w3bd = _block_diag_1x1(p["w3"], lane_group).astype(_MXU_DTYPE)
    rows = [tile(p["sb1"][0]), tile(p["sb1"][1]),
            tile(p["sb2"][0]), tile(p["sb2"][1]),
            tile(p["sb3"][0]), tile(p["sb3"][1])]
    rows += [tile(p["w2"][r]) for r in range(9)]
    rows.append(jnp.pad(p["bse1"].reshape(-1), (0, wc - c // 2)))
    rows.append(tile(p["bse2"]))
    vec = jnp.concatenate(
        [jnp.stack(rows, axis=0), jnp.tile(p["wse2"], (1, w_spatial))], axis=0)
    assert vec.shape[0] == ROW_WSE2 + c // 2
    # Global average pool (1/(H*W)) + SE FC1 fused into one (W*c, c//2) weight.
    wse1_eff = jnp.tile(p["wse1"], (w_spatial, 1)) / float(w_spatial * h_spatial)
    return w1bd, w3bd, vec.astype(jnp.float32), wse1_eff.astype(jnp.float32)


def _batch_block(n, h, wc, vmem_budget=_VMEM_BUDGET):
    """Images per grid step: VMEM-budgeted, preferring >= 4 (then >= 2) steps."""
    per_img = 2 * 2 * h * wc * 4          # (in + out) * double-buffered * f32
    cap = max(1, vmem_budget // per_img)
    for min_steps in (4, 2, 1):           # >= 2 steps per v7x TensorCore first
        cands = [d for d in range(1, n + 1)
                 if n % d == 0 and d <= cap and n // d >= min_steps]
        if cands:
            return max(cands)
    return 1


def _se_branch(x2_l, p, *, c):
    """Runs the Pallas kernel on the x2 branch.  x2_l: (N, H, W*c) lane-dense."""
    n, h, wc = x2_l.shape
    w_spatial = wc // c
    lane_group = _lane_group(w_spatial, c)
    gwc = lane_group * c
    w1bd, w3bd, vec, wse1_eff = _pack_branch_params(p, c, w_spatial, h, lane_group)
    n_blk = _batch_block(n, h, wc)
    n_rows = vec.shape[0]
    const = lambda g: (0, 0)

    # Explicit VMEM limit with headroom (v7x: 64 MiB physical, 32 MiB default).
    vmem_need = (2 * gwc * gwc * 2                           # two bf16 weights
                 + (n_rows * wc + wc * (c // 2)) * 4         # vec + fused SE FC1
                 + 2 * 2 * n_blk * h * wc * 4)               # in+out, double buf
    vmem_limit = int(min(48 << 20, max(3 * vmem_need, 16 << 20)))

    # NOTE: the four constant-index blocks (weights/vec) never change across
    # grid steps; pl.Buffered(1) could single-buffer them, but they are already
    # tiny thanks to the 256-lane cap, so we keep the default pipelining.
    grid_spec = pltpu.PrefetchScalarGridSpec(
        num_scalar_prefetch=0,
        grid=(n // n_blk,),
        in_specs=[
            pl.BlockSpec((n_blk, h, wc), lambda g: (g, 0, 0)),   # x2 (lane-dense)
            pl.BlockSpec((gwc, gwc), const),                     # conv1 weight
            pl.BlockSpec((gwc, gwc), const),                     # conv3 weight
            pl.BlockSpec((n_rows, wc), const),                   # packed vectors
            pl.BlockSpec((wc, c // 2), const),                   # SE FC1 (pool fused)
        ],
        out_specs=pl.BlockSpec((n_blk, h, wc), lambda g: (g, 0, 0)),
    )
    return pl.pallas_call(
        functools.partial(_se_branch_kernel, c=c),
        out_shape=jax.ShapeDtypeStruct((n, h, wc), x2_l.dtype),
        grid_spec=grid_spec,
        compiler_params=pltpu.CompilerParams(
            dimension_semantics=("parallel",),
            vmem_limit_bytes=vmem_limit),
    )(x2_l, w1bd, w3bd, vec, wse1_eff)


@functools.partial(jax.jit, static_argnames=("shuffle_groups",))
def se_block_forward(x_nchw, params, shuffle_groups=2):
    """Full SEBlock forward.  x_nchw: (N, C, H, W) like the PyTorch module."""
    n, ch, h, w = x_nchw.shape
    c = ch // 2
    x1 = x_nchw[:, :c]
    x2 = x_nchw[:, c:]
    # NCHW -> lane-dense (N, H, W*c) for the kernel.
    x2_l = jnp.transpose(x2, (0, 2, 3, 1)).reshape(n, h, w * c)
    y2_l = _se_branch(x2_l, params, c=c)
    y2 = jnp.transpose(y2_l.reshape(n, h, w, c), (0, 3, 1, 2))
    if shuffle_groups == 2:
        # concat + channel_shuffle(g=2) is exactly a channel interleave of
        # (x1, y2): fuse into a single stack+reshape (one HBM pass).
        # TODO(synk): folding this interleave into the kernel's output index
        # map would cost the lane-dense store; kept as XLA glue.
        out = jnp.stack([x1, y2], axis=2).reshape(n, ch, h, w)
    else:
        out = jnp.concatenate([x1, y2], axis=1)
        g = shuffle_groups
        out = (out.reshape(n, g, ch // g, h, w)
                  .transpose(0, 2, 1, 3, 4).reshape(n, ch, h, w))
    return out


# ---------------------------------------------------------------------------
# Deterministic synthetic parameters (BN folded into scale/bias)
# ---------------------------------------------------------------------------
def init_params(key, c):
    ks = jax.random.split(key, 10)

    def bn_fold(k):
        k1, k2, k3, k4 = jax.random.split(k, 4)
        gamma = jax.random.uniform(k1, (c,), jnp.float32, 0.5, 1.5)
        beta = 0.1 * jax.random.normal(k2, (c,), jnp.float32)
        mean = 0.1 * jax.random.normal(k3, (c,), jnp.float32)
        var = jax.random.uniform(k4, (c,), jnp.float32, 0.5, 1.5)
        scale = gamma * jax.lax.rsqrt(var + 1e-5)
        bias = beta - mean * scale
        return jnp.stack([scale, bias], axis=0)          # (2, c)

    return dict(
        w1=0.3 * jax.random.normal(ks[0], (c, c), jnp.float32),        # 1x1, (in, out)
        sb1=bn_fold(ks[1]),
        w2=0.3 * jax.random.normal(ks[2], (9, c), jnp.float32),        # 3x3 dw taps
        sb2=bn_fold(ks[3]),
        w3=0.3 * jax.random.normal(ks[4], (c, c), jnp.float32),
        sb3=bn_fold(ks[5]),
        wse1=0.3 * jax.random.normal(ks[6], (c, c // 2), jnp.float32),
        bse1=0.1 * jax.random.normal(ks[7], (1, c // 2), jnp.float32),
        wse2=0.3 * jax.random.normal(ks[8], (c // 2, c), jnp.float32),
        bse2=0.1 * jax.random.normal(ks[9], (1, c), jnp.float32),
    )


# ---------------------------------------------------------------------------
# Pure-JAX (lax.conv) reference mirroring the PyTorch NCHW semantics
# ---------------------------------------------------------------------------
def ref_forward_nchw(x, p, shuffle_groups=2):
    c = x.shape[1] // 2
    x1, x2 = x[:, :c], x[:, c:]
    dn = ("NCHW", "OIHW", "NCHW")

    def conv1x1_bn(v, w_io, sb, relu):
        w = jnp.transpose(w_io)[:, :, None, None]        # (out, in, 1, 1)
        y = jax.lax.conv_general_dilated(v, w, (1, 1), ((0, 0), (0, 0)),
                                         dimension_numbers=dn)
        y = y * sb[0][None, :, None, None] + sb[1][None, :, None, None]
        return jnp.maximum(y, 0.0) if relu else y

    y = conv1x1_bn(x2, p["w1"], p["sb1"], True)
    w2 = jnp.transpose(p["w2"].reshape(3, 3, c), (2, 0, 1))[:, None]   # (c,1,3,3)
    y = jax.lax.conv_general_dilated(y, w2, (1, 1), ((1, 1), (1, 1)),
                                     dimension_numbers=dn, feature_group_count=c)
    y = y * p["sb2"][0][None, :, None, None] + p["sb2"][1][None, :, None, None]
    y = conv1x1_bn(y, p["w3"], p["sb3"], True)
    s = jnp.mean(y, axis=(2, 3))                         # (N, c)
    s = jnp.maximum(s @ p["wse1"] + p["bse1"], 0.0)
    s = jax.nn.sigmoid(s @ p["wse2"] + p["bse2"])
    y = y * s[:, :, None, None]
    out = jnp.concatenate([x1, y], axis=1)
    n, ch, h, w = out.shape
    g = shuffle_groups
    return out.reshape(n, g, ch // g, h, w).transpose(0, 2, 1, 3, 4).reshape(n, ch, h, w)


if __name__ == "__main__":
    key = jax.random.PRNGKey(0)
    kx, kp = jax.random.split(key)
    N, C, H, W = 2, 16, 16, 16          # in_channels=16 -> branch channels c=8, W*c=128
    x = jax.random.normal(kx, (N, C, H, W), jnp.float32)
    params = init_params(kp, C // 2)

    out = jax.block_until_ready(se_block_forward(x, params))
    ref = jax.block_until_ready(ref_forward_nchw(x, params))

    assert out.shape == x.shape
    # conv1/conv3 use bf16 MXU operands (f32 accumulation) -> bf16-level tolerance.
    scaled_err = float(jnp.max(jnp.abs(out - ref) / (1.0 + jnp.abs(ref))))
    assert scaled_err < 5e-2, f"kernel/reference mismatch: {scaled_err}"
    print("KERNEL_OK")
</pallas_src>

<mosaic_0001>
module attributes {stable_mosaic.version = 11 : i64} {
  func.func @_se_branch_kernel(%arg0: i32, %arg1: memref<1x16x128xf32, #tpu.memory_space<vmem>>, %arg2: memref<128x128xbf16, #tpu.memory_space<vmem>>, %arg3: memref<128x128xbf16, #tpu.memory_space<vmem>>, %arg4: memref<21x128xf32, #tpu.memory_space<vmem>>, %arg5: memref<128x4xf32, #tpu.memory_space<vmem>>, %arg6: memref<1x16x128xf32, #tpu.memory_space<vmem>>) attributes {dimension_semantics = [#tpu.dimension_semantics<parallel>], iteration_bounds = array<i64: 2>, scalar_prefetch = 0 : i64, scratch_operands = 0 : i64, tpu.core_type = #tpu.core_type<tc>, window_params = [{transform_indices = @transform_0, window_bounds = array<i64: 1, 16, 128>}, {pipeline_mode = #tpu.pipeline_mode<synchronous>, transform_indices = @transform_1, window_bounds = array<i64: 128, 128>}, {pipeline_mode = #tpu.pipeline_mode<synchronous>, transform_indices = @transform_2, window_bounds = array<i64: 128, 128>}, {pipeline_mode = #tpu.pipeline_mode<synchronous>, transform_indices = @transform_3, window_bounds = array<i64: 21, 128>}, {pipeline_mode = #tpu.pipeline_mode<synchronous>, transform_indices = @transform_4, window_bounds = array<i64: 128, 4>}, {transform_indices = @transform_5, window_bounds = array<i64: 1, 16, 128>}]} {
    %c0 = arith.constant 0 : index
    %c0_0 = arith.constant 0 : index
    %0 = vector.load %arg4[%c0, %c0_0] : memref<21x128xf32, #tpu.memory_space<vmem>>, vector<21x128xf32>
    %c0_1 = arith.constant 0 : index
    %c0_2 = arith.constant 0 : index
    %c0_3 = arith.constant 0 : index
    %1 = vector.load %arg1[%c0_1, %c0_2, %c0_3] : memref<1x16x128xf32, #tpu.memory_space<vmem>>, vector<1x16x128xf32>
    %2 = vector.shape_cast %1 : vector<1x16x128xf32> to vector<16x128xf32>
    %3 = arith.truncf %2 : vector<16x128xf32> to vector<16x128xbf16>
    %c0_4 = arith.constant 0 : index
    %c0_5 = arith.constant 0 : index
    %4 = vector.load %arg2[%c0_4, %c0_5] : memref<128x128xbf16, #tpu.memory_space<vmem>>, vector<128x128xbf16>
    %cst = arith.constant dense<0.000000e+00> : vector<16x128xf32>
    %5 = tpu.matmul %3, %4, %cst {dimension_numbers = #tpu.dot_dimension_numbers<[1], [0], [0], [1], [0, 0, 1, 1], [], []>} : vector<16x128xbf16>, vector<128x128xbf16>, vector<16x128xf32> -> vector<16x128xf32>
    %6 = vector.extract_strided_slice %0 {offsets = [0, 0], sizes = [1, 128], strides = [1, 1]} : vector<21x128xf32> to vector<1x128xf32>
    %7 = vector.shape_cast %6 : vector<1x128xf32> to vector<128xf32>
    %8 = vector.shape_cast %7 : vector<128xf32> to vector<1x128xf32>
    %9 = vector.broadcast %8 : vector<1x128xf32> to vector<16x128xf32>
    %10 = arith.mulf %5, %9 : vector<16x128xf32>
    %11 = vector.extract_strided_slice %0 {offsets = [1, 0], sizes = [1, 128], strides = [1, 1]} : vector<21x128xf32> to vector<1x128xf32>
    %12 = vector.shape_cast %11 : vector<1x128xf32> to vector<128xf32>
    %13 = vector.shape_cast %12 : vector<128xf32> to vector<1x128xf32>
    %14 = vector.broadcast %13 : vector<1x128xf32> to vector<16x128xf32>
    %15 = arith.addf %10, %14 : vector<16x128xf32>
    %cst_6 = arith.constant 0.000000e+00 : f32
    %16 = vector.broadcast %cst_6 : f32 to vector<16x128xf32>
    %17 = arith.maximumf %15, %16 : vector<16x128xf32>
    %18 = tpu.iota {dimensions = array<i32: 1>} : vector<1x128xi32>
    %c8_i32 = arith.constant 8 : i32
    %19 = vector.broadcast %c8_i32 : i32 to vector<1x128xi32>
    %20 = arith.cmpi sge, %18, %19 : vector<1x128xi32>
    %21 = arith.extui %20 : vector<1x128xi1> to vector<1x128xi32>
    %22 = arith.sitofp %21 : vector<1x128xi32> to vector<1x128xf32>
    %c120_i32 = arith.constant 120 : i32
    %23 = vector.broadcast %c120_i32 : i32 to vector<1x128xi32>
    %24 = arith.cmpi slt, %18, %23 : vector<1x128xi32>
    %25 = arith.extui %24 : vector<1x128xi1> to vector<1x128xi32>
    %26 = arith.sitofp %25 : vector<1x128xi32> to vector<1x128xf32>
    %c8_i32_7 = arith.constant 8 : i32
    %27 = tpu.dynamic_rotate %17 by %c8_i32_7 dim 1 : vector<16x128xf32>, i32 -> vector<16x128xf32>
    %28 = vector.broadcast %22 : vector<1x128xf32> to vector<16x128xf32>
    %29 = arith.mulf %27, %28 : vector<16x128xf32>
    %c120_i32_8 = arith.constant 120 : i32
    %30 = tpu.dynamic_rotate %17 by %c120_i32_8 dim 1 : vector<16x128xf32>, i32 -> vector<16x128xf32>
    %31 = vector.broadcast %26 : vector<1x128xf32> to vector<16x128xf32>
    %32 = arith.mulf %30, %31 : vector<16x128xf32>
    %33 = vector.extract_strided_slice %0 {offsets = [6, 0], sizes = [1, 128], strides = [1, 1]} : vector<21x128xf32> to vector<1x128xf32>
    %34 = vector.shape_cast %33 : vector<1x128xf32> to vector<128xf32>
    %35 = vector.shape_cast %34 : vector<128xf32> to vector<1x128xf32>
    %36 = vector.broadcast %35 : vector<1x128xf32> to vector<16x128xf32>
    %37 = arith.mulf %36, %29 : vector<16x128xf32>
    %38 = vector.extract_strided_slice %0 {offsets = [7, 0], sizes = [1, 128], strides = [1, 1]} : vector<21x128xf32> to vector<1x128xf32>
    %39 = vector.shape_cast %38 : vector<1x128xf32> to vector<128xf32>
    %40 = vector.shape_cast %39 : vector<128xf32> to vector<1x128xf32>
    %41 = vector.broadcast %40 : vector<1x128xf32> to vector<16x128xf32>
    %42 = arith.mulf %41, %17 : vector<16x128xf32>
    %43 = arith.addf %37, %42 : vector<16x128xf32>
    %44 = vector.extract_strided_slice %0 {offsets = [8, 0], sizes = [1, 128], strides = [1, 1]} : vector<21x128xf32> to vector<1x128xf32>
    %45 = vector.shape_cast %44 : vector<1x128xf32> to vector<128xf32>
    %46 = vector.shape_cast %45 : vector<128xf32> to vector<1x128xf32>
    %47 = vector.broadcast %46 : vector<1x128xf32> to vector<16x128xf32>
    %48 = arith.mulf %47, %32 : vector<16x128xf32>
    %49 = arith.addf %43, %48 : vector<16x128xf32>
    %50 = vector.extract_strided_slice %0 {offsets = [9, 0], sizes = [1, 128], strides = [1, 1]} : vector<21x128xf32> to vector<1x128xf32>
    %51 = vector.shape_cast %50 : vector<1x128xf32> to vector<128xf32>
    %52 = vector.shape_cast %51 : vector<128xf32> to vector<1x128xf32>
    %53 = vector.broadcast %52 : vector<1x128xf32> to vector<16x128xf32>
    %54 = arith.mulf %53, %29 : vector<16x128xf32>
    %55 = vector.extract_strided_slice %0 {offsets = [10, 0], sizes = [1, 128], strides = [1, 1]} : vector<21x128xf32> to vector<1x128xf32>
    %56 = vector.shape_cast %55 : vector<1x128xf32> to vector<128xf32>
    %57 = vector.shape_cast %56 : vector<128xf32> to vector<1x128xf32>
    %58 = vector.broadcast %57 : vector<1x128xf32> to vector<16x128xf32>
    %59 = arith.mulf %58, %17 : vector<16x128xf32>
    %60 = arith.addf %54, %59 : vector<16x128xf32>
    %61 = vector.extract_strided_slice %0 {offsets = [11, 0], sizes = [1, 128], strides = [1, 1]} : vector<21x128xf32> to vector<1x128xf32>
    %62 = vector.shape_cast %61 : vector<1x128xf32> to vector<128xf32>
    %63 = vector.shape_cast %62 : vector<128xf32> to vector<1x128xf32>
    %64 = vector.broadcast %63 : vector<1x128xf32> to vector<16x128xf32>
    %65 = arith.mulf %64, %32 : vector<16x128xf32>
    %66 = arith.addf %60, %65 : vector<16x128xf32>
    %67 = vector.extract_strided_slice %0 {offsets = [12, 0], sizes = [1, 128], strides = [1, 1]} : vector<21x128xf32> to vector<1x128xf32>
    %68 = vector.shape_cast %67 : vector<1x128xf32> to vector<128xf32>
    %69 = vector.shape_cast %68 : vector<128xf32> to vector<1x128xf32>
    %70 = vector.broadcast %69 : vector<1x128xf32> to vector<16x128xf32>
    %71 = arith.mulf %70, %29 : vector<16x128xf32>
    %72 = vector.extract_strided_slice %0 {offsets = [13, 0], sizes = [1, 128], strides = [1, 1]} : vector<21x128xf32> to vector<1x128xf32>
    %73 = vector.shape_cast %72 : vector<1x128xf32> to vector<128xf32>
    %74 = vector.shape_cast %73 : vector<128xf32> to vector<1x128xf32>
    %75 = vector.broadcast %74 : vector<1x128xf32> to vector<16x128xf32>
    %76 = arith.mulf %75, %17 : vector<16x128xf32>
    %77 = arith.addf %71, %76 : vector<16x128xf32>
    %78 = vector.extract_strided_slice %0 {offsets = [14, 0], sizes = [1, 128], strides = [1, 1]} : vector<21x128xf32> to vector<1x128xf32>
    %79 = vector.shape_cast %78 : vector<1x128xf32> to vector<128xf32>
    %80 = vector.shape_cast %79 : vector<128xf32> to vector<1x128xf32>
    %81 = vector.broadcast %80 : vector<1x128xf32> to vector<16x128xf32>
    %82 = arith.mulf %81, %32 : vector<16x128xf32>
    %83 = arith.addf %77, %82 : vector<16x128xf32>
    %84 = tpu.iota {dimensions = array<i32: 1>} : vector<1x16x1xi32>
    %85 = vector.shape_cast %84 : vector<1x16x1xi32> to vector<16x1xi32>
    %c1_i32 = arith.constant 1 : i32
    %86 = vector.broadcast %c1_i32 : i32 to vector<16x1xi32>
    %87 = arith.cmpi sge, %85, %86 : vector<16x1xi32>
    %88 = arith.extui %87 : vector<16x1xi1> to vector<16x1xi32>
    %89 = arith.sitofp %88 : vector<16x1xi32> to vector<16x1xf32>
    %c15_i32 = arith.constant 15 : i32
    %90 = vector.broadcast %c15_i32 : i32 to vector<16x1xi32>
    %91 = arith.cmpi slt, %85, %90 : vector<16x1xi32>
    %92 = arith.extui %91 : vector<16x1xi1> to vector<16x1xi32>
    %93 = arith.sitofp %92 : vector<16x1xi32> to vector<16x1xf32>
    %c1_i32_9 = arith.constant 1 : i32
    %94 = tpu.dynamic_rotate %49 by %c1_i32_9 dim 0 : vector<16x128xf32>, i32 -> vector<16x128xf32>
    %95 = vector.broadcast %89 : vector<16x1xf32> to vector<16x128xf32>
    %96 = arith.mulf %94, %95 : vector<16x128xf32>
    %97 = arith.addf %66, %96 : vector<16x128xf32>
    %c15_i32_10 = arith.constant 15 : i32
    %98 = tpu.dynamic_rotate %83 by %c15_i32_10 dim 0 : vector<16x128xf32>, i32 -> vector<16x128xf32>
    %99 = vector.broadcast %93 : vector<16x1xf32> to vector<16x128xf32>
    %100 = arith.mulf %98, %99 : vector<16x128xf32>
    %101 = arith.addf %97, %100 : vector<16x128xf32>
    %102 = vector.extract_strided_slice %0 {offsets = [2, 0], sizes = [1, 128], strides = [1, 1]} : vector<21x128xf32> to vector<1x128xf32>
    %103 = vector.shape_cast %102 : vector<1x128xf32> to vector<128xf32>
    %104 = vector.shape_cast %103 : vector<128xf32> to vector<1x128xf32>
    %105 = vector.broadcast %104 : vector<1x128xf32> to vector<16x128xf32>
    %106 = arith.mulf %101, %105 : vector<16x128xf32>
    %107 = vector.extract_strided_slice %0 {offsets = [3, 0], sizes = [1, 128], strides = [1, 1]} : vector<21x128xf32> to vector<1x128xf32>
    %108 = vector.shape_cast %107 : vector<1x128xf32> to vector<128xf32>
    %109 = vector.shape_cast %108 : vector<128xf32> to vector<1x128xf32>
    %110 = vector.broadcast %109 : vector<1x128xf32> to vector<16x128xf32>
    %111 = arith.addf %106, %110 : vector<16x128xf32>
    %112 = arith.truncf %111 : vector<16x128xf32> to vector<16x128xbf16>
    %c0_11 = arith.constant 0 : index
    %c0_12 = arith.constant 0 : index
    %113 = vector.load %arg3[%c0_11, %c0_12] : memref<128x128xbf16, #tpu.memory_space<vmem>>, vector<128x128xbf16>
    %cst_13 = arith.constant dense<0.000000e+00> : vector<16x128xf32>
    %114 = tpu.matmul %112, %113, %cst_13 {dimension_numbers = #tpu.dot_dimension_numbers<[1], [0], [0], [1], [0, 0, 1, 1], [], []>} : vector<16x128xbf16>, vector<128x128xbf16>, vector<16x128xf32> -> vector<16x128xf32>
    %115 = vector.extract_strided_slice %0 {offsets = [4, 0], sizes = [1, 128], strides = [1, 1]} : vector<21x128xf32> to vector<1x128xf32>
    %116 = vector.shape_cast %115 : vector<1x128xf32> to vector<128xf32>
    %117 = vector.shape_cast %116 : vector<128xf32> to vector<1x128xf32>
    %118 = vector.broadcast %117 : vector<1x128xf32> to vector<16x128xf32>
    %119 = arith.mulf %114, %118 : vector<16x128xf32>
    %120 = vector.extract_strided_slice %0 {offsets = [5, 0], sizes = [1, 128], strides = [1, 1]} : vector<21x128xf32> to vector<1x128xf32>
    %121 = vector.shape_cast %120 : vector<1x128xf32> to vector<128xf32>
    %122 = vector.shape_cast %121 : vector<128xf32> to vector<1x128xf32>
    %123 = vector.broadcast %122 : vector<1x128xf32> to vector<16x128xf32>
    %124 = arith.addf %119, %123 : vector<16x128xf32>
    %cst_14 = arith.constant 0.000000e+00 : f32
    %125 = vector.broadcast %cst_14 : f32 to vector<16x128xf32>
    %126 = arith.maximumf %124, %125 : vector<16x128xf32>
    %127 = vector.shape_cast %126 : vector<16x128xf32> to vector<1x16x128xf32>
    %cst_15 = arith.constant dense<0.000000e+00> : vector<1x128xf32>
    %128 = vector.multi_reduction <add>, %127, %cst_15 [1] : vector<1x16x128xf32> to vector<1x128xf32>
    %c0_16 = arith.constant 0 : index
    %c0_17 = arith.constant 0 : index
    %129 = vector.load %arg5[%c0_16, %c0_17] : memref<128x4xf32, #tpu.memory_space<vmem>>, vector<128x4xf32>
    %cst_18 = arith.constant dense<0.000000e+00> : vector<1x4xf32>
    %130 = tpu.matmul %128, %129, %cst_18 {dimension_numbers = #tpu.dot_dimension_numbers<[1], [0], [0], [1], [0, 0, 1, 1], [], []>} : vector<1x128xf32>, vector<128x4xf32>, vector<1x4xf32> -> vector<1x4xf32>
    %131 = vector.extract_strided_slice %0 {offsets = [15, 0], sizes = [1, 4], strides = [1, 1]} : vector<21x128xf32> to vector<1x4xf32>
    %132 = vector.shape_cast %131 : vector<1x4xf32> to vector<4xf32>
    %133 = vector.shape_cast %132 : vector<4xf32> to vector<1x4xf32>
    %134 = arith.addf %130, %133 : vector<1x4xf32>
    %cst_19 = arith.constant 0.000000e+00 : f32
    %135 = vector.broadcast %cst_19 : f32 to vector<1x4xf32>
    %136 = arith.maximumf %134, %135 : vector<1x4xf32>
    %137 = vector.extract_strided_slice %0 {offsets = [16, 0], sizes = [1, 128], strides = [1, 1]} : vector<21x128xf32> to vector<1x128xf32>
    %138 = vector.shape_cast %137 : vector<1x128xf32> to vector<128xf32>
    %139 = vector.extract_strided_slice %136 {offsets = [0, 0], sizes = [1, 1], strides = [1, 1]} : vector<1x4xf32> to vector<1x1xf32>
    %140 = vector.extract_strided_slice %0 {offsets = [17, 0], sizes = [1, 128], strides = [1, 1]} : vector<21x128xf32> to vector<1x128xf32>
    %141 = vector.shape_cast %140 : vector<1x128xf32> to vector<128xf32>
    %142 = vector.shape_cast %141 : vector<128xf32> to vector<1x128xf32>
    %143 = vector.broadcast %139 : vector<1x1xf32> to vector<1x128xf32>
    %144 = arith.mulf %143, %142 : vector<1x128xf32>
    %145 = vector.shape_cast %138 : vector<128xf32> to vector<1x128xf32>
    %146 = arith.addf %145, %144 : vector<1x128xf32>
    %147 = vector.extract_strided_slice %136 {offsets = [0, 1], sizes = [1, 1], strides = [1, 1]} : vector<1x4xf32> to vector<1x1xf32>
    %148 = vector.extract_strided_slice %0 {offsets = [18, 0], sizes = [1, 128], strides = [1, 1]} : vector<21x128xf32> to vector<1x128xf32>
    %149 = vector.shape_cast %148 : vector<1x128xf32> to vector<128xf32>
    %150 = vector.shape_cast %149 : vector<128xf32> to vector<1x128xf32>
    %151 = vector.broadcast %147 : vector<1x1xf32> to vector<1x128xf32>
    %152 = arith.mulf %151, %150 : vector<1x128xf32>
    %153 = arith.addf %146, %152 : vector<1x128xf32>
    %154 = vector.extract_strided_slice %136 {offsets = [0, 2], sizes = [1, 1], strides = [1, 1]} : vector<1x4xf32> to vector<1x1xf32>
    %155 = vector.extract_strided_slice %0 {offsets = [19, 0], sizes = [1, 128], strides = [1, 1]} : vector<21x128xf32> to vector<1x128xf32>
    %156 = vector.shape_cast %155 : vector<1x128xf32> to vector<128xf32>
    %157 = vector.shape_cast %156 : vector<128xf32> to vector<1x128xf32>
    %158 = vector.broadcast %154 : vector<1x1xf32> to vector<1x128xf32>
    %159 = arith.mulf %158, %157 : vector<1x128xf32>
    %160 = arith.addf %153, %159 : vector<1x128xf32>
    %161 = vector.extract_strided_slice %136 {offsets = [0, 3], sizes = [1, 1], strides = [1, 1]} : vector<1x4xf32> to vector<1x1xf32>
    %162 = vector.extract_strided_slice %0 {offsets = [20, 0], sizes = [1, 128], strides = [1, 1]} : vector<21x128xf32> to vector<1x128xf32>
    %163 = vector.shape_cast %162 : vector<1x128xf32> to vector<128xf32>
    %164 = vector.shape_cast %163 : vector<128xf32> to vector<1x128xf32>
    %165 = vector.broadcast %161 : vector<1x1xf32> to vector<1x128xf32>
    %166 = arith.mulf %165, %164 : vector<1x128xf32>
    %167 = arith.addf %160, %166 : vector<1x128xf32>
    %168 = arith.negf %167 : vector<1x128xf32>
    %169 = math.exp %168 : vector<1x128xf32>
    %cst_20 = arith.constant 1.000000e+00 : f32
    %170 = vector.broadcast %cst_20 : f32 to vector<1x128xf32>
    %171 = arith.addf %170, %169 : vector<1x128xf32>
    %172 = arith.divf %170, %171 : vector<1x128xf32>
    %173 = vector.shape_cast %126 : vector<16x128xf32> to vector<1x16x128xf32>
    %174 = vector.shape_cast %172 : vector<1x128xf32> to vector<1x1x128xf32>
    %175 = vector.broadcast %174 : vector<1x1x128xf32> to vector<1x16x128xf32>
    %176 = arith.mulf %173, %175 : vector<1x16x128xf32>
    %c0_21 = arith.constant 0 : index
    %c0_22 = arith.constant 0 : index
    %c0_23 = arith.constant 0 : index
    %177 = vector.load %arg6[%c0_21, %c0_22, %c0_23] : memref<1x16x128xf32, #tpu.memory_space<vmem>>, vector<1x16x128xf32>
    tpu.vector_store %arg6[%c0_21, %c0_22, %c0_23], %176 {strides = array<i32>} : memref<1x16x128xf32, #tpu.memory_space<vmem>>, vector<1x16x128xf32>,
    return
  }
  func.func @transform_0(%arg0: i32) -> (i32, i32, i32) {
    %c0_i32 = arith.constant 0 : i32
    %c0_i32_0 = arith.constant 0 : i32
    %c0_i32_1 = arith.constant 0 : i32
    return %arg0, %c0_i32, %c0_i32_0 : i32, i32, i32
  }
  func.func @transform_1(%arg0: i32) -> (i32, i32) {
    %c0_i32 = arith.constant 0 : i32
    %c0_i32_0 = arith.constant 0 : i32
    %c0_i32_1 = arith.constant 0 : i32
    return %c0_i32, %c0_i32_0 : i32, i32
  }
  func.func @transform_2(%arg0: i32) -> (i32, i32) {
    %c0_i32 = arith.constant 0 : i32
    %c0_i32_0 = arith.constant 0 : i32
    %c0_i32_1 = arith.constant 0 : i32
    return %c0_i32, %c0_i32_0 : i32, i32
  }
  func.func @transform_3(%arg0: i32) -> (i32, i32) {
    %c0_i32 = arith.constant 0 : i32
    %c0_i32_0 = arith.constant 0 : i32
    %c0_i32_1 = arith.constant 0 : i32
    return %c0_i32, %c0_i32_0 : i32, i32
  }
  func.func @transform_4(%arg0: i32) -> (i32, i32) {
    %c0_i32 = arith.constant 0 : i32
    %c0_i32_0 = arith.constant 0 : i32
    %c0_i32_1 = arith.constant 0 : i32
    return %c0_i32, %c0_i32_0 : i32, i32
  }
  func.func @transform_5(%arg0: i32) -> (i32, i32, i32) {
    %c0_i32 = arith.constant 0 : i32
    %c0_i32_0 = arith.constant 0 : i32
    %c0_i32_1 = arith.constant 0 : i32
    return %arg0, %c0_i32, %c0_i32_0 : i32, i32, i32
  }
}

</mosaic_0001>

<bundles_post_ra>
// kernel: tile.94
= control target key start
LH: loop header
LB: loop body
LE: loop exit
PB: predicated region body
PF: predicated region fallthrough
CT: control target
= control target key end

     0   :  { %s28_s0 = inlined_call_operand.vmem [shape: f32[8], index: 0, kind: input, shape index: {}]   ;;  %s29_s1 = inlined_call_operand.vmem [shape: f32[16,8], index: 1, kind: output, shape index: {}]  }
   0x1   :  { %v4_v0 = vld [vmem:[%s28_s0] ss:$0 sm:$0xff] }
   0x2   :  { %5 = vst [vmem:[%s29_s1] sm:$0xff] %v4_v0  ;;  %8 = vst [vmem:[%s29_s1 + $0x8] sm:$0xff] %v4_v0 }

// kernel: tile.128
= control target key start
LH: loop header
LB: loop body
LE: loop exit
PB: predicated region body
PF: predicated region fallthrough
CT: control target
= control target key end

     0   :  { %s131_s10 = smov 120   ;;  %s132_s11 = smov 104   ;;  %vm3_vm0 = vcmask 64512   ;;  %vm9_vm1 = vcmask 1048512   ;;  %vm15_vm2 = vcmask 982912   ;;  %vm21_vm3 = vcmask 917312   ;;  %s207_s0 = inlined_call_operand.vmem [shape: f32[16,8], index: 0, kind: input, shape index: {}]   ;;  %s208_s1 = inlined_call_operand.vmem [shape: f32[1,128], index: 1, kind: output, shape index: {}]  }
   0x1   :  { %v101_v0 = vld [vmem:[%s207_s0 + $0xf] sm:$0x1]   ;;  %v103_v1 = vld [vmem:[%s207_s0 + $0xd] sm:$0x1]   ;;  %v102_v2 = vld [vmem:[%s207_s0 + $0xe] sm:$0x1]  }
   0x2   :  { %7 = vrot.lane.b32.xlu0 %v101_v0, %s131_s10  ;;  %19 = vrot.lane.b32.xlu1 %v103_v1, %s132_s11  ;;  %v104_v3 = vld [vmem:[%s207_s0 + $0xc] sm:$0x1]   ;;  %s133_s16 = smov 112   ;;  %s134_s17 = smov 96   ;;  %v105_v4 = vld [vmem:[%s207_s0 + $0xb] sm:$0x1]  }
   0x3   :  { %v106_v5 = vld [vmem:[%s207_s0 + $0xa] sm:$0x1]   ;;  %v2_v6 = vld [vmem:[%s207_s0] sm:$0x1]   ;;  %s135_s24 = smov 88   ;;  %s136_s25 = smov 80  }
   0x4   :  { %4 = vst.msk [vmem:[#allocation0] sm:$0x1] %vm3_vm0, %v2_v6   ;;  %v107_v7 = vld [vmem:[%s207_s0 + $0x9] sm:$0x1]   ;;  %v108_v8 = vld [vmem:[%s207_s0 + $0x8] sm:$0x1]  }
   0x5   :  { %s137_s30 = smov 72   ;;  %s138_s2 = smov 64   ;;  %v109_v9 = vld [vmem:[%s207_s0 + $0x7] sm:$0x1]   ;;  %v110_v10 = vld [vmem:[%s207_s0 + $0x6] sm:$0x1]  }
   0x6   :  { %13 = vrot.lane.b32.xlu0 %v102_v2, %s133_s16  ;;  %25 = vrot.lane.b32.xlu1 %v104_v3, %s134_s17  ;;  %s139_s7 = smov 56   ;;  %s140_s8 = smov 48   ;;  %v111_v11 = vld [vmem:[%s207_s0 + $0x5] sm:$0x1]   ;;  %v112_v12 = vld [vmem:[%s207_s0 + $0x4] sm:$0x1]  }
   0x7   :  { %s141_s13 = smov 40   ;;  %s142_s14 = smov 32   ;;  %v113_v13 = vld [vmem:[%s207_s0 + $0x3] sm:$0x1]   ;;  %v114_v14 = vld [vmem:[%s207_s0 + $0x2] sm:$0x1]  }
   0x8   :  { %s143_s19 = smov 24   ;;  %s144_s20 = smov 16   ;;  %v115_v15 = vld [vmem:[%s207_s0 + $0x1] sm:$0x1]   ;;  %vm27_vm4 = vcmask 851712   ;;  %vm33_vm5 = vcmask 786112  }
   0x9   :  { %s145_s0 = smov 8   ;;  %vm39_vm6 = vcmask 720512   ;;  %vm45_vm7 = vcmask 654912   ;;  %vm51_vm8 = vcmask 589312   ;;  %vm57_vm9 = vcmask 523712  }
   0xa   :  { %31 = vrot.lane.b32.xlu0 %v105_v4, %s135_s24  ;;  %37 = vrot.lane.b32.xlu1 %v106_v5, %s136_s25  ;;  %vm63_vm10 = vcmask 458112   ;;  %vm69_vm11 = vcmask 392512   ;;  %vm75_vm12 = vcmask 326912   ;;  %vm81_vm13 = vcmask 261312  }
   0xb   :  { %vm87_vm14 = vcmask 195712   ;;  %vm93_vm15 = vcmask 130112  }
   0xe   :  { %43 = vrot.lane.b32.xlu0 %v107_v7, %s137_s30  ;;  %49 = vrot.lane.b32.xlu1 %v108_v8, %s138_s2 }
  0x12   :  { %55 = vrot.lane.b32.xlu0 %v109_v9, %s139_s7  ;;  %61 = vrot.lane.b32.xlu1 %v110_v10, %s140_s8 }
  0x16   :  { %67 = vrot.lane.b32.xlu0 %v111_v11, %s141_s13  ;;  %73 = vrot.lane.b32.xlu1 %v112_v12, %s142_s14 }
  0x1a   :  { %79 = vrot.lane.b32.xlu0 %v113_v13, %s143_s19  ;;  %85 = vrot.lane.b32.xlu1 %v114_v14, %s144_s20 }
  0x1e   :  { %91 = vrot.lane.b32.xlu0 %v115_v15, %s145_s0 }
  0x74   :  { %v8_v16 = vpop.permute.xlu0 %7   ;;  %v20_v17 = vpop.permute.xlu1 %19  }
  0x75   :  { %10 = vst.msk [vmem:[#allocation0] sm:$0x1] %vm9_vm1, %v8_v16  }
  0x78   :  { %v14_v18 = vpop.permute.xlu0 %13   ;;  %v26_v19 = vpop.permute.xlu1 %25  }
  0x79   :  { %16 = vst.msk [vmem:[#allocation0] sm:$0x1] %vm15_vm2, %v14_v18  }
  0x7a   :  { %22 = vst.msk [vmem:[#allocation0] sm:$0x1] %vm21_vm3, %v20_v17  }
  0x7b   :  { %28 = vst.msk [vmem:[#allocation0] sm:$0x1] %vm27_vm4, %v26_v19  }
  0x7c   :  { %v32_v20 = vpop.permute.xlu0 %31   ;;  %v38_v21 = vpop.permute.xlu1 %37  }
  0x7d   :  { %34 = vst.msk [vmem:[#allocation0] sm:$0x1] %vm33_vm5, %v32_v20  }
  0x7e   :  { %40 = vst.msk [vmem:[#allocation0] sm:$0x1] %vm39_vm6, %v38_v21  }
  0x80   :  { %v44_v22 = vpop.permute.xlu0 %43   ;;  %v50_v23 = vpop.permute.xlu1 %49  }
  0x81   :  { %46 = vst.msk [vmem:[#allocation0] sm:$0x1] %vm45_vm7, %v44_v22  }
  0x82   :  { %52 = vst.msk [vmem:[#allocation0] sm:$0x1] %vm51_vm8, %v50_v23  }
  0x84   :  { %v56_v24 = vpop.permute.xlu0 %55   ;;  %v62_v25 = vpop.permute.xlu1 %61  }
  0x85   :  { %58 = vst.msk [vmem:[#allocation0] sm:$0x1] %vm57_vm9, %v56_v24  }
  0x86   :  { %64 = vst.msk [vmem:[#allocation0] sm:$0x1] %vm63_vm10, %v62_v25  }
  0x88   :  { %v68_v26 = vpop.permute.xlu0 %67   ;;  %v74_v27 = vpop.permute.xlu1 %73  }
  0x89   :  { %70 = vst.msk [vmem:[#allocation0] sm:$0x1] %vm69_vm11, %v68_v26  }
  0x8a   :  { %76 = vst.msk [vmem:[#allocation0] sm:$0x1] %vm75_vm12, %v74_v27  }
  0x8c   :  { %v80_v28 = vpop.permute.xlu0 %79   ;;  %v86_v29 = vpop.permute.xlu1 %85  }
  0x8d   :  { %82 = vst.msk [vmem:[#allocation0] sm:$0x1] %vm81_vm13, %v80_v28  }
  0x8e   :  { %88 = vst.msk [vmem:[#allocation0] sm:$0x1] %vm87_vm14, %v86_v29  }
  0x90   :  { %v92_v30 = vpop.permute.xlu0 %91  }
  0x91   :  { %94 = vst.msk [vmem:[#allocation0] sm:$0x1] %vm93_vm15, %v92_v30  }
  0x98   :  { %v98_v31 = vld [vmem:[#allocation0] sm:$0x1] }
  0x99   :  { %100 = vst [vmem:[%s208_s1] sm:$0x1] %v98_v31 }

// kernel: tile.142
= control target key start
LH: loop header
LB: loop body
LE: loop exit
PB: predicated region body
PF: predicated region fallthrough
CT: control target
= control target key end

     0   :  { %vm6_vm0 = vcmask 1043458   ;;  %s11_s6 = smov 3  ;;  %s14_s7 = smov 12  ;;  %vm8_vm1 = vcmask 64512   ;;  %vm20_vm2 = vcmask 1048512   ;;  %vm32_vm3 = vcmask 982912   ;;  %s381_s0 = inlined_call_operand.vmem [shape: f32[4,16,8], index: 0, kind: input, shape index: {}]   ;;  %s382_s1 = inlined_call_operand.vmem [shape: f32[4,128], index: 1, kind: output, shape index: {}]  }
   0x1   :  { %v196_v0 = vld [vmem:[%s381_s0 + $0xf] ss:$16 sm:%s11_s6]   ;;  %s35_s12 = smov 3  ;;  %s38_s15 = smov 12  ;;  %vm44_vm4 = vcmask 917312   ;;  %vm56_vm5 = vcmask 851712  }
   0x2   :  { %v197_v1 = vld [vmem:[%s381_s0 + $0xf] ss:$16 sm:%s14_s7]   ;;  %v200_v3 = vld [vmem:[%s381_s0 + $0xd] ss:$16 sm:%s35_s12]   ;;  %s241_s16 = smov 120   ;;  %s23_s19 = smov 3 }
   0x3   :  { %v17_v2 = vsel %vm6_vm0, %v197_v1, %v196_v0  ;;  %v201_v4 = vld [vmem:[%s381_s0 + $0xd] ss:$16 sm:%s38_s15]   ;;  %s26_s20 = smov 12  ;;  %v198_v6 = vld [vmem:[%s381_s0 + $0xe] ss:$16 sm:%s23_s19]   ;;  %s47_s25 = smov 3 }
   0x4   :  { %18 = vrot.lane.b32.xlu0 %v17_v2, %s241_s16  ;;  %v41_v5 = vsel %vm6_vm0, %v201_v4, %v200_v3  ;;  %v199_v7 = vld [vmem:[%s381_s0 + $0xe] ss:$16 sm:%s26_s20]   ;;  %s242_s26 = smov 104   ;;  %s50_s29 = smov 12  ;;  %vm68_vm6 = vcmask 786112   ;;  %vm80_vm7 = vcmask 720512  }
   0x5   :  { %42 = vrot.lane.b32.xlu1 %v41_v5, %s242_s26  ;;  %v29_v8 = vsel %vm6_vm0, %v199_v7, %v198_v6  ;;  %v202_v9 = vld [vmem:[%s381_s0 + $0xc] ss:$16 sm:%s47_s25]   ;;  %s59_s3 = smov 3  ;;  %s62_s4 = smov 12  ;;  %vm92_vm8 = vcmask 654912   ;;  %vm104_vm9 = vcmask 589312  }
   0x6   :  { %v203_v10 = vld [vmem:[%s381_s0 + $0xc] ss:$16 sm:%s50_s29]   ;;  %s243_s5 = smov 112   ;;  %v204_v12 = vld [vmem:[%s381_s0 + $0xb] ss:$16 sm:%s59_s3]   ;;  %s71_s8 = smov 3 }
   0x7   :  { %v53_v11 = vsel %vm6_vm0, %v203_v10, %v202_v9  ;;  %v205_v13 = vld [vmem:[%s381_s0 + $0xb] ss:$16 sm:%s62_s4]   ;;  %v206_v14 = vld [vmem:[%s381_s0 + $0xa] ss:$16 sm:%s71_s8]   ;;  %s74_s13 = smov 12  ;;  %s244_s14 = smov 96  }
   0x8   :  { %30 = vrot.lane.b32.xlu0 %v29_v8, %s243_s5  ;;  %v65_v15 = vsel %vm6_vm0, %v205_v13, %v204_v12  ;;  %v207_v16 = vld [vmem:[%s381_s0 + $0xa] ss:$16 sm:%s74_s13]   ;;  %s83_s17 = smov 3  ;;  %s86_s18 = smov 12  ;;  %vm116_vm10 = vcmask 523712   ;;  %vm128_vm11 = vcmask 458112  }
   0x9   :  { %54 = vrot.lane.b32.xlu1 %v53_v11, %s244_s14  ;;  %v77_v17 = vsel %vm6_vm0, %v207_v16, %v206_v14  ;;  %v208_v18 = vld [vmem:[%s381_s0 + $0x9] ss:$16 sm:%s83_s17]   ;;  %s95_s23 = smov 3  ;;  %s245_s24 = smov 88   ;;  %vm140_vm12 = vcmask 392512   ;;  %vm152_vm13 = vcmask 326912  }
   0xa   :  { %v209_v19 = vld [vmem:[%s381_s0 + $0x9] ss:$16 sm:%s86_s18]   ;;  %v210_v20 = vld [vmem:[%s381_s0 + $0x8] ss:$16 sm:%s95_s23]   ;;  %s98_s27 = smov 12  ;;  %s107_s30 = smov 3 }
   0xb   :  { %v89_v21 = vsel %vm6_vm0, %v209_v19, %v208_v18  ;;  %v211_v22 = vld [vmem:[%s381_s0 + $0x8] ss:$16 sm:%s98_s27]   ;;  %s110_s2 = smov 12  ;;  %s246_s3 = smov 80   ;;  %v212_v23 = vld [vmem:[%s381_s0 + $0x7] ss:$16 sm:%s107_s30]  }
   0xc   :  { %66 = vrot.lane.b32.xlu0 %v65_v15, %s245_s24  ;;  %s119_s6 = smov 3  ;;  %v101_v24 = vsel %vm6_vm0, %v211_v22, %v210_v20  ;;  %v213_v25 = vld [vmem:[%s381_s0 + $0x7] ss:$16 sm:%s110_s2]   ;;  %s122_s11 = smov 12  ;;  %vm164_vm14 = vcmask 261312   ;;  %vm176_vm15 = vcmask 195712  }
   0xd   :  { %78 = vrot.lane.b32.xlu1 %v77_v17, %s246_s3  ;;  %v214_v26 = vld [vmem:[%s381_s0 + $0x6] ss:$16 sm:%s119_s6]   ;;  %s247_s12 = smov 72   ;;  %s131_s15 = smov 3  ;;  %v113_v28 = vsel %vm6_vm0, %v213_v25, %v212_v23 }
   0xe   :  { %v215_v27 = vld [vmem:[%s381_s0 + $0x6] ss:$16 sm:%s122_s11]   ;;  %s134_s16 = smov 12  ;;  %v216_v29 = vld [vmem:[%s381_s0 + $0x5] ss:$16 sm:%s131_s15]   ;;  %s143_s19 = smov 3 }
   0xf   :  { %s248_s20 = smov 64   ;;  %v217_v30 = vld [vmem:[%s381_s0 + $0x5] ss:$16 sm:%s134_s16]   ;;  %s146_s23 = smov 12  ;;  %v125_v31 = vsel %vm6_vm0, %v215_v27, %v214_v26  ;;  %v218_v32 = vld [vmem:[%s381_s0 + $0x4] ss:$16 sm:%s143_s19]  }
  0x10   :  { %90 = vrot.lane.b32.xlu0 %v89_v21, %s247_s12  ;;  %s155_s26 = smov 3  ;;  %s158_s27 = smov 12  ;;  %v219_v33 = vld [vmem:[%s381_s0 + $0x4] ss:$16 sm:%s146_s23]   ;;  %v137_v34 = vsel %vm6_vm0, %v217_v30, %v216_v29 }
  0x11   :  { %102 = vrot.lane.b32.xlu1 %v101_v24, %s248_s20  ;;  %s249_s28 = smov 56   ;;  %s167_s2 = smov 3  ;;  %v220_v35 = vld [vmem:[%s381_s0 + $0x3] ss:$16 sm:%s155_s26]   ;;  %v149_v37 = vsel %vm6_vm0, %v219_v33, %v218_v32 }
  0x12   :  { %s170_s5 = smov 12  ;;  %s250_s6 = smov 48   ;;  %v221_v36 = vld [vmem:[%s381_s0 + $0x3] ss:$16 sm:%s158_s27]   ;;  %v222_v38 = vld [vmem:[%s381_s0 + $0x2] ss:$16 sm:%s167_s2]  }
  0x13   :  { %s179_s9 = smov 3  ;;  %v223_v39 = vld [vmem:[%s381_s0 + $0x2] ss:$16 sm:%s170_s5]   ;;  %s182_s14 = smov 12  ;;  %v161_v41 = vsel %vm6_vm0, %v221_v36, %v220_v35 }
  0x14   :  { %114 = vrot.lane.b32.xlu0 %v113_v28, %s249_s28  ;;  %s2_s15 = smov 3  ;;  %s251_s16 = smov 40   ;;  %v224_v42 = vld [vmem:[%s381_s0 + $0x1] ss:$16 sm:%s179_s9]   ;;  %v173_v46 = vsel %vm6_vm0, %v223_v39, %v222_v38 }
  0x15   :  { %126 = vrot.lane.b32.xlu1 %v125_v31, %s250_s6  ;;  %v3_v40 = vld [vmem:[%s381_s0] ss:$16 sm:%s2_s15]   ;;  %s4_s19 = smov 12  ;;  %s252_s24 = smov 32  }
  0x16   :  { %v5_v43 = vld [vmem:[%s381_s0] ss:$16 sm:%s4_s19]   ;;  %v225_v44 = vld [vmem:[%s381_s0 + $0x1] ss:$16 sm:%s182_s14]   ;;  %s253_s0 = smov 24   ;;  %s254_s27 = smov 16  }
  0x17   :  { %v7_v45 = vsel %vm6_vm0, %v5_v43, %v3_v40  ;;  %v185_v47 = vsel %vm6_vm0, %v225_v44, %v224_v42  ;;  %s255_s28 = smov 8   ;;  %vm188_vm0 = vcmask 130112  }
  0x18   :  { %138 = vrot.lane.b32.xlu0 %v137_v34, %s251_s16  ;;  %9 = vst.msk [vmem:[#allocation0] sm:$0xf] %vm8_vm1, %v7_v45  }
  0x19   :  { %150 = vrot.lane.b32.xlu1 %v149_v37, %s252_s24 }
  0x1c   :  { %162 = vrot.lane.b32.xlu0 %v161_v41, %s253_s0 }
  0x1d   :  { %174 = vrot.lane.b32.xlu1 %v173_v46, %s254_s27 }
  0x20   :  { %186 = vrot.lane.b32.xlu0 %v185_v47, %s255_s28 }
  0x76   :  { %v19_v48 = vpop.permute.xlu0 %18  }
  0x77   :  { %21 = vst.msk [vmem:[#allocation0] sm:$0xf] %vm20_vm2, %v19_v48   ;;  %v43_v49 = vpop.permute.xlu1 %42  }
  0x7a   :  { %v31_v50 = vpop.permute.xlu0 %30  }
  0x7b   :  { %33 = vst.msk [vmem:[#allocation0] sm:$0xf] %vm32_vm3, %v31_v50   ;;  %v55_v51 = vpop.permute.xlu1 %54  }
  0x7c   :  { %45 = vst.msk [vmem:[#allocation0] sm:$0xf] %vm44_vm4, %v43_v49  }
  0x7d   :  { %57 = vst.msk [vmem:[#allocation0] sm:$0xf] %vm56_vm5, %v55_v51  }
  0x7e   :  { %v67_v52 = vpop.permute.xlu0 %66  }
  0x7f   :  { %69 = vst.msk [vmem:[#allocation0] sm:$0xf] %vm68_vm6, %v67_v52   ;;  %v79_v53 = vpop.permute.xlu1 %78  }
  0x80   :  { %81 = vst.msk [vmem:[#allocation0] sm:$0xf] %vm80_vm7, %v79_v53  }
  0x82   :  { %v91_v54 = vpop.permute.xlu0 %90  }
  0x83   :  { %93 = vst.msk [vmem:[#allocation0] sm:$0xf] %vm92_vm8, %v91_v54   ;;  %v103_v55 = vpop.permute.xlu1 %102  }
  0x84   :  { %105 = vst.msk [vmem:[#allocation0] sm:$0xf] %vm104_vm9, %v103_v55  }
  0x86   :  { %v115_v56 = vpop.permute.xlu0 %114  }
  0x87   :  { %117 = vst.msk [vmem:[#allocation0] sm:$0xf] %vm116_vm10, %v115_v56   ;;  %v127_v57 = vpop.permute.xlu1 %126  }
  0x88   :  { %129 = vst.msk [vmem:[#allocation0] sm:$0xf] %vm128_vm11, %v127_v57  }
  0x8a   :  { %v139_v58 = vpop.permute.xlu0 %138  }
  0x8b   :  { %141 = vst.msk [vmem:[#allocation0] sm:$0xf] %vm140_vm12, %v139_v58   ;;  %v151_v59 = vpop.permute.xlu1 %150  }
  0x8c   :  { %153 = vst.msk [vmem:[#allocation0] sm:$0xf] %vm152_vm13, %v151_v59  }
  0x8e   :  { %v163_v60 = vpop.permute.xlu0 %162  }
  0x8f   :  { %165 = vst.msk [vmem:[#allocation0] sm:$0xf] %vm164_vm14, %v163_v60   ;;  %v175_v61 = vpop.permute.xlu1 %174  }
  0x90   :  { %177 = vst.msk [vmem:[#allocation0] sm:$0xf] %vm176_vm15, %v175_v61  }
  0x92   :  { %v187_v62 = vpop.permute.xlu0 %186  }
  0x93   :  { %189 = vst.msk [vmem:[#allocation0] sm:$0xf] %vm188_vm0, %v187_v62  }
  0x9a   :  { %v193_v63 = vld [vmem:[#allocation0] sm:$0xf] }
  0x9b   :  { %195 = vst [vmem:[%s382_s1] sm:$0xf] %v193_v63 }

// kernel: se_block_forward.1
= control target key start
LH: loop header
LB: loop body
LE: loop exit
PB: predicated region body
PF: predicated region fallthrough
CT: control target
= control target key end

     0   :  { %s1058_s18 = smov 0   ;;  %s1294_s0 = inlined_call_operand.vmem [shape: f32[2,16,128], index: 0, kind: input, shape index: {}]   ;;  %s1295_s1 = inlined_call_operand.vmem [shape: bf16[128,128], index: 1, kind: input, shape index: {}]   ;;  %s1296_s2 = inlined_call_operand.vmem [shape: bf16[128,128], index: 2, kind: input, shape index: {}]   ;;  %s1297_s3 = inlined_call_operand.vmem [shape: f32[21,128], index: 3, kind: input, shape index: {}]   ;;  %s1298_s4 = inlined_call_operand.vmem [shape: f32[128,4], index: 4, kind: input, shape index: {}]   ;;  %s1299_s5 = inlined_call_operand.vmem [shape: f32[2,16,128], index: 5, kind: output, shape index: {}]  }
   0x1 LB: > { %s802_s19 = sadd.s32 4294967295, %s1017_s18   ;;  %p806_p0 = scmp.ge.s32.totalorder %s1017_s18, 1  ;;  %s1017_s18 = sphi %s1058_s18, %s15_s18  }
   0x2   : > { %p187_p1 = scmp.lt.s32.totalorder %s1017_s18, 3 }
   0x4   : > { %p188_p2 = pnand %p806_p0, %p187_p1 }
   0x5   : > { %v991_v0 = vld [vmem:[%s1295_s1] sm:$0xff] (!%p188_p2)   ;;  %v1019_v1 = vmov (!%p188_p2), 0.0   ;;  %v992_v2 = vld [vmem:[%s1295_s1 + $0x8] sm:$0xff] (!%p188_p2)   ;;  %vm1020_vm0 = vmmov (!%p188_p2), 0   ;;  %v993_v3 = vld [vmem:[%s1295_s1 + $0x10] sm:$0xff] (!%p188_p2)   ;;  %p215_p3 = scmp.lt.s32.totalorder (!%p188_p2), %s802_s19, 1  ;;  %v337_v13 = vlaneseq (!%p188_p2) }
   0x6   : > { %191 = sbr.rel (%p188_p2) target bundleno = 1018 (0x3fa), region = 40  ;;  %871 = vmatprep.subr.bf16.mxu0 (!%p188_p2), %v1019_v1  ;;  %891 = vmatprep.subr.bf16.mxu1 (!%p188_p2), %v1019_v1  ;;  %v994_v4 = vld [vmem:[%s1295_s1 + $0x18] sm:$0xff] (!%p188_p2)   ;;  %v995_v5 = vld [vmem:[%s1295_s1 + $0x20] sm:$0xff] (!%p188_p2)   ;;  %v996_v6 = vld [vmem:[%s1295_s1 + $0x28] sm:$0xff] (!%p188_p2)   ;;  %s1021_s29 = smov (!%p188_p2), 120   ;;  %v1023_v40 = vmov (!%p188_p2), 0.0|0.0  }
   0x7   : > { %872 = vmatpush3.bf16.msra.mxu0 (!%p188_p2), %v991_v0  ;;  %887 = vmatprep.mubr.msk.bf16.mxu0 (!%p188_p2), %vm1020_vm0, %v1019_v1  ;;  %v997_v7 = vld [vmem:[%s1295_s1 + $0x30] sm:$0xff] (!%p188_p2)   ;;  %v998_v8 = vld [vmem:[%s1295_s1 + $0x38] sm:$0xff] (!%p188_p2)   ;;  %v999_v12 = vld [vmem:[%s1296_s2] sm:$0xff] (!%p188_p2)   ;;  %v1117_v14 = vshrl.u32 (!%p188_p2), %v337_v13, 7  ;;  %s1022_s30 = smov (!%p188_p2), 8   ;;  %v352_v44 = vand.u32 (!%p188_p2), 127, %v337_v13 }
   0x8   : > { %873 = vmatprep.subr.bf16.mxu0 (!%p188_p2), %v1019_v1  ;;  %907 = vmatprep.mubr.msk.bf16.mxu1 (!%p188_p2), %vm1020_vm0, %v1019_v1  ;;  %v1000_v16 = vld [vmem:[%s1296_s2 + $0x8] sm:$0xff] (!%p188_p2)   ;;  %v1128_v17 = vld [vmem:[%s1297_s3] sm:$0xff] (!%p188_p2)  ;;  %v1001_v20 = vld [vmem:[%s1296_s2 + $0x10] sm:$0xff] (!%p188_p2)  }
   0x9   : > { %892 = vmatpush3.bf16.msra.mxu1 (!%p188_p2), %v999_v12  ;;  %v1120_v15 = vsub.s32 (!%p188_p2), 0, %v1117_v14  ;;  %v345_v18 = vsub.s32 (!%p188_p2), 1, %v1117_v14  ;;  %v1002_v26 = vld [vmem:[%s1296_s2 + $0x18] sm:$0xff] (!%p188_p2)   ;;  %v1003_v32 = vld [vmem:[%s1296_s2 + $0x20] sm:$0xff] (!%p188_p2)   ;;  %v1004_v34 = vld [vmem:[%s1296_s2 + $0x28] sm:$0xff] (!%p188_p2)   ;;  %vm356_vm1 = vcmp.lt.s32.totalorder (!%p188_p2), %v352_v44, 120 }
   0xa   : > { %893 = vmatprep.subr.bf16.mxu1 (!%p188_p2), %v1019_v1  ;;  %v1005_v35 = vld [vmem:[%s1296_s2 + $0x30] sm:$0xff] (!%p188_p2)   ;;  %v1006_v36 = vld [vmem:[%s1296_s2 + $0x38] sm:$0xff] (!%p188_p2)   ;;  %v609_v37 = vld [vmem:[%s1298_s4] sm:$0xff] (!%p188_p2)  ;;  %v373_v45 = vsub.s32 (!%p188_p2), 6, %v1117_v14  ;;  %vm353_vm2 = vcmp.ge.s32.totalorder (!%p188_p2), %v352_v44, 8  ;;  %v379_v46 = vsub.s32 (!%p188_p2), 7, %v1117_v14 }
   0xb   : > { %874 = vmatpush3.bf16.msra.mxu0 (!%p188_p2), %v992_v2  ;;  %v340_v19 = vrot.slane (!%p188_p2), %v1128_v17, %v1120_v15  ;;  %v346_v21 = vrot.slane (!%p188_p2), %v1128_v17, %v345_v18  ;;  %v610_v38 = vld [vmem:[%s1298_s4 + $0x8] sm:$0xff] (!%p188_p2)  ;;  %v611_v39 = vld [vmem:[%s1298_s4 + $0x10] sm:$0xff] (!%p188_p2)  ;;  %v612_v42 = vld [vmem:[%s1298_s4 + $0x18] sm:$0xff] (!%p188_p2)  ;;  %v401_v47 = vsub.s32 (!%p188_p2), 2, %v1117_v14  ;;  %v417_v48 = vsub.s32 (!%p188_p2), 4, %v1117_v14 }
   0xc   : > { %875 = vmatprep.subr.bf16.mxu0 (!%p188_p2), %v1019_v1  ;;  %v947_v41 = vpack.c.bf16 (!%p188_p2), %v610_v38, %v609_v37  ;;  %v950_v43 = vpack.c.bf16 (!%p188_p2), %v612_v42, %v611_v39  ;;  %v423_v49 = vsub.s32 (!%p188_p2), 5, %v1117_v14  ;;  %v1191_v50 = vld [vmem:[%s1297_s3 + $0x8] sm:$0xff] (!%p188_p2)  ;;  %v409_v51 = vsub.s32 (!%p188_p2), 3, %v1117_v14 }
   0xd   : > { %s1301_s19 = smov (!%p215_p3, %s802_s19), 1  ;;  %894 = vmatpush3.bf16.msra.mxu1 %v1000_v16  ;;  %v820_v52 = vsel %vm356_vm1, 1.0, %v1019_v1  ;;  %v819_v53 = vsel %vm353_vm2, 1.0, %v1019_v1  ;;  %v374_v54 = vrot.slane %v1128_v17, %v373_v45  ;;  %v380_v55 = vrot.slane %v1128_v17, %v379_v46 }
   0xe   : > { %s834_s7 = sshll.u32 %s1301_s19, 4  ;;  %895 = vmatprep.subr.bf16.mxu1 %v1019_v1  ;;  %v396_v57 = vrot.slane %v1191_v50, %v345_v18  ;;  %v402_v58 = vrot.slane %v1191_v50, %v401_v47  ;;  %v418_v59 = vrot.slane %v1191_v50, %v417_v48  ;;  %v424_v60 = vrot.slane %v1191_v50, %v423_v49 }
   0xf   : > { %876 = vmatpush3.bf16.msra.mxu0 %v993_v3  ;;  %s219_s12 = scalar_lea.vmem %s1294_s0, %s834_s7  ;;  %v388_v62 = vrot.slane %v1191_v50, %v1120_v15  ;;  %v410_v63 = vrot.slane %v1191_v50, %v409_v51  ;;  %v432_v3 = vrot.slane %v1191_v50, %v373_v45  ;;  %vm440_vm3 = vcmp.ge.s32.totalorder %v1117_v14, 1  ;;  %s224_s6 = scalar_lea.vmem %s1299_s5, %s834_s7 }
  0x10   : > { %877 = vmatprep.subr.bf16.mxu0 %v1019_v1  ;;  %v229_v9 = vld [vmem:[%s219_s12] sm:$0xff]  ;;  %v230_v10 = vld [vmem:[%s219_s12 + $0x8] sm:$0xff]  ;;  %vm454_vm5 = vcmp.lt.s32.totalorder %v1117_v14, 1  ;;  %v821_v46 = vsel %vm440_vm3, 1.0, %v1019_v1  ;;  %vm463_vm6 = vcmp.lt.s32.totalorder %v1117_v14, 7 }
  0x11   : > { %v231_v11 = vpack.c.bf16 %v230_v10, %v229_v9  ;;  %896 = vmatpush3.bf16.msra.mxu1 %v1001_v20 }
  0x12   : > { %897 = vmatprep.subr.bf16.mxu1 %v1019_v1 }
  0x13   : > { %878 = vmatpush3.bf16.msra.mxu0 %v994_v4 }
  0x14   : > { %879 = vmatprep.subr.bf16.mxu0 %v1019_v1 }
  0x15   : > { %898 = vmatpush3.bf16.msra.mxu1 %v1002_v26  ;;  %v439_v26 = vadd.s32 8, %v1117_v14  ;;  %v1024_v14 = vmov 1  }
  0x16   : > { %899 = vmatprep.subr.bf16.mxu1 %v1019_v1  ;;  %988 = vset.pattern.permute.xlu1 %v1024_v14 }
  0x17   : > { %880 = vmatpush3.bf16.msra.mxu0 %v995_v5  ;;  %vm447_vm4 = vcmp.lt.s32.totalorder %v439_v26, 15  ;;  %v591_v26 = vrot.slane %v1128_v17, %v417_v48 }
  0x18   : > { %881 = vmatprep.subr.bf16.mxu0 %v1019_v1 }
  0x19   : > { %900 = vmatpush3.bf16.msra.mxu1 %v1003_v32 }
  0x1a   : > { %901 = vmatprep.subr.bf16.mxu1 %v1019_v1 }
  0x1b   : > { %882 = vmatpush3.bf16.msra.mxu0 %v996_v6 }
  0x1c   : > { %883 = vmatprep.subr.bf16.mxu0 %v1019_v1 }
  0x1d   : > { %902 = vmatpush3.bf16.msra.mxu1 %v1004_v34 }
  0x1e   : > { %903 = vmatprep.subr.bf16.mxu1 %v1019_v1 }
  0x1f   : > { %884 = vmatpush3.bf16.msra.mxu0 %v997_v7 }
  0x20   : > { %885 = vmatprep.subr.bf16.mxu0 %v1019_v1 }
  0x21   : > { %904 = vmatpush3.bf16.msra.mxu1 %v1005_v35 }
  0x22   : > { %905 = vmatprep.subr.bf16.mxu1 %v1019_v1 }
  0x23   : > { %886 = vmatpush3.bf16.msra.mxu0 %v998_v8 }
  0x24   : > { %946 = vmatprep.subr.bf16.mxu0 %v1023_v40 }
  0x25   : > { %906 = vmatpush3.bf16.msra.mxu1 %v1006_v36 }
  0x26   : > { %888 = vmatmul.mubr.bf16.vlgmr.msra.gmra.mrb[0].mxu0 %v231_v11 }
  0x27   : > { %943 = vmatprep.mubr.msk.f32.mxu0 %vm1020_vm0, %v1019_v1  ;;  %948 = vmatpush3.bf16.msra.mxu0 %v947_v41 }
  0x28   : > { %949 = vmatprep.subr.bf16.mxu0 %v1023_v40 }
  0x2b   : > { %951 = vmatpush3.bf16.msra.mxu0 %v950_v43 }
  0x2c   : > { %952 = vmatprep.subr.bf16.mxu0 %v1023_v40 }
  0xf9   : > { %v330_v22 = vpop.f32.mrb[0].mxu0 }
  0xfa   : > { %v341_v23 = vmul.f32 %v340_v19, %v330_v22  ;;  %v889_v24 = vpop.f32.mrb[1].mxu0 }
  0xfb   : > { %v333_v25 = vpop.f32.mrb[2].mxu0 }
  0xfc   : > { %v347_v27 = vadd.f32 %v346_v21, %v341_v23  ;;  %v342_v28 = vmul.f32 %v340_v19, %v333_v25  ;;  %v890_v29 = vpop.f32.mrb[3].mxu0 }
  0xfe   : > { %v1144_v30 = vmax.f32 %v347_v27, 0.0  ;;  %v348_v31 = vadd.f32 %v346_v21, %v342_v28 }
 0x100   : > { %365 = vrot.lane.b32.xlu1 %v1144_v30, %s1021_s29  ;;  %359 = vrot.lane.b32.xlu0 %v1144_v30, %s1022_s30  ;;  %v1152_v33 = vmax.f32 %v348_v31, 0.0  ;;  %v381_v5 = vmul.f32 %v380_v55, %v1144_v30  ;;  %v403_v7 = vmul.f32 %v402_v58, %v1144_v30  ;;  %v425_v9 = vmul.f32 %v424_v60, %v1144_v30 }
 0x102   : > { %v382_v24 = vmul.f32 %v380_v55, %v1152_v33  ;;  %v404_v25 = vmul.f32 %v402_v58, %v1152_v33  ;;  %v426_v32 = vmul.f32 %v424_v60, %v1152_v33 }
 0x104   : > { %367 = vrot.lane.b32.xlu1 %v1152_v33, %s1021_s29  ;;  %361 = vrot.lane.b32.xlu0 %v1152_v33, %s1022_s30 }
 0x172   : > { %v366_v56 = vpop.permute.xlu1 %365  ;;  %v360_v61 = vpop.permute.xlu0 %359 }
 0x173   : > { %v369_v0 = vmul.f32 %v820_v52, %v366_v56  ;;  %v363_v2 = vmul.f32 %v819_v53, %v360_v61  ;;  %v473_v61 = vrot.slane %v1128_v17, %v401_v47  ;;  %v614_v47 = vld [vmem:[%s1298_s4 + $0x28] sm:$0xff] }
 0x175   : > { %v375_v4 = vmul.f32 %v374_v54, %v363_v2  ;;  %v397_v6 = vmul.f32 %v396_v57, %v363_v2  ;;  %v419_v8 = vmul.f32 %v418_v59, %v363_v2  ;;  %v389_v12 = vmul.f32 %v388_v62, %v369_v0 }
 0x176   : > { %v368_v10 = vpop.permute.xlu1 %367  ;;  %v362_v11 = vpop.permute.xlu0 %361  ;;  %v411_v13 = vmul.f32 %v410_v63, %v369_v0  ;;  %v433_v19 = vmul.f32 %v432_v3, %v369_v0  ;;  %v479_v2 = vrot.slane %v1128_v17, %v409_v51  ;;  %v615_v51 = vld [vmem:[%s1298_s4 + $0x30] sm:$0xff] }
 0x177   : > { %v383_v16 = vadd.f32 %v381_v5, %v375_v4  ;;  %v364_v18 = vmul.f32 %v819_v53, %v362_v11  ;;  %v405_v20 = vadd.f32 %v403_v7, %v397_v6  ;;  %v427_v21 = vadd.f32 %v425_v9, %v419_v8  ;;  %v613_v7 = vld [vmem:[%s1298_s4 + $0x20] sm:$0xff]  ;;  %v616_v9 = vld [vmem:[%s1298_s4 + $0x38] sm:$0xff] }
 0x178   : > { %v370_v22 = vmul.f32 %v820_v52, %v368_v10  ;;  %v822_v53 = vsel %vm447_vm4, 1.0, %v1019_v1  ;;  %v953_v8 = vpack.c.bf16 %v614_v47, %v613_v7  ;;  %v956_v10 = vpack.c.bf16 %v616_v9, %v615_v51  ;;  %v617_v11 = vld [vmem:[%s1298_s4 + $0x40] sm:$0xff] }
 0x179   : > { %v391_v23 = vadd.f32 %v389_v12, %v383_v16  ;;  %v413_v27 = vadd.f32 %v411_v13, %v405_v20  ;;  %v435_v28 = vadd.f32 %v433_v19, %v427_v21  ;;  %v376_v29 = vmul.f32 %v374_v54, %v364_v18  ;;  %v618_v12 = vld [vmem:[%s1298_s4 + $0x48] sm:$0xff]  ;;  %v619_v16 = vld [vmem:[%s1298_s4 + $0x50] sm:$0xff]  ;;  %v621_v20 = vld [vmem:[%s1298_s4 + $0x60] sm:$0xff] }
 0x17a   : > { %v398_v30 = vmul.f32 %v396_v57, %v364_v18  ;;  %v420_v31 = vmul.f32 %v418_v59, %v364_v18  ;;  %v390_v34 = vmul.f32 %v388_v62, %v370_v22  ;;  %v412_v35 = vmul.f32 %v410_v63, %v370_v22  ;;  %954 = vmatpush3.bf16.msra.mxu0 %v953_v8  ;;  %v620_v18 = vld [vmem:[%s1298_s4 + $0x58] sm:$0xff]  ;;  %v622_v21 = vld [vmem:[%s1298_s4 + $0x68] sm:$0xff] }
 0x17b   : > { %v384_v36 = vadd.f32 %v382_v24, %v376_v29  ;;  %v434_v38 = vmul.f32 %v432_v3, %v370_v22  ;;  %v452_v44 = vrot.slane %v391_v23, 7  ;;  %v461_v33 = vrot.slane %v435_v28, 1  ;;  %955 = vmatprep.subr.bf16.mxu0 %v1023_v40  ;;  %v623_v23 = vld [vmem:[%s1298_s4 + $0x70] sm:$0xff]  ;;  %v624_v24 = vld [vmem:[%s1298_s4 + $0x78] sm:$0xff] }
 0x17c   : > { %v406_v37 = vadd.f32 %v404_v25, %v398_v30  ;;  %v428_v39 = vadd.f32 %v426_v32, %v420_v31  ;;  %v959_v13 = vpack.c.bf16 %v618_v12, %v617_v11  ;;  %v962_v19 = vpack.c.bf16 %v620_v18, %v619_v16 }
 0x17d   : > { %v392_v41 = vadd.f32 %v390_v34, %v384_v36  ;;  %v965_v22 = vpack.c.bf16 %v622_v21, %v621_v20  ;;  %v968_v25 = vpack.c.bf16 %v624_v24, %v623_v23 }
 0x17e   : > { %v414_v42 = vadd.f32 %v412_v35, %v406_v37  ;;  %v436_v43 = vadd.f32 %v434_v38, %v428_v39  ;;  %957 = vmatpush3.bf16.msra.mxu0 %v956_v10 }
 0x17f   : > { %v453_v45 = vrot.slane %v392_v41, 7  ;;  %958 = vmatprep.subr.bf16.mxu0 %v1023_v40 }
 0x180   : > { %v462_v52 = vrot.slane %v436_v43, 1 }
 0x181   : > { %v455_v54 = vsel %vm454_vm5, %v452_v44, %v453_v45  ;;  %v456_v55 = vsel %vm454_vm5, %v453_v45, %v452_v44 }
 0x182   : > { %v460_v56 = vadd.f32 %v455_v54, %v414_v42  ;;  %v457_v57 = vmul.f32 %v821_v46, %v456_v55  ;;  %v464_v58 = vsel %vm463_vm6, %v461_v33, %v462_v52  ;;  %v465_v59 = vsel %vm463_vm6, %v462_v52, %v461_v33  ;;  %960 = vmatpush3.bf16.msra.mxu0 %v959_v13  ;;  %v228_v55 = vld [vmem:[%s1297_s3 + $0x10] sm:$0x1f] }
 0x183   : > { %v467_v60 = vmul.f32 %v822_v53, %v465_v59  ;;  %961 = vmatprep.subr.bf16.mxu0 %v1023_v40  ;;  %v1026_v53 = vmov 2   ;;  %v1027_v54 = vmov 3  }
 0x184   : > { %v459_v62 = vadd.f32 %v457_v57, %v413_v27  ;;  %v597_v27 = vrot.slane %v1128_v17, %v423_v49  ;;  %v1025_v17 = vmov 0   ;;  %v626_v49 = vrot.slane %v1191_v50, 7 }
 0x185   : > { %v469_v63 = vadd.f32 %v467_v60, %v460_v56  ;;  %987 = vset.pattern.permute.xlu0 %v1025_v17  ;;  %v705_v56 = vrot.slane %v228_v55, 1  ;;  %v713_v57 = vrot.slane %v228_v55, 2  ;;  %v721_v60 = vrot.slane %v228_v55, 3 }
 0x186   : > { %v468_v0 = vadd.f32 %v464_v58, %v459_v62  ;;  %963 = vmatpush3.bf16.msra.mxu0 %v962_v19 }
 0x187   : > { %v475_v3 = vmul.f32 %v473_v61, %v469_v63  ;;  %964 = vmatprep.subr.bf16.mxu0 %v1023_v40  ;;  %v729_v63 = vrot.slane %v228_v55, 4 }
 0x188   : > { %v474_v1 = vmul.f32 %v473_v61, %v468_v0 }
 0x189   : > { %v481_v5 = vadd.f32 %v479_v2, %v475_v3 }
 0x18a   : > { %v480_v4 = vadd.f32 %v479_v2, %v474_v1  ;;  %966 = vmatpush3.bf16.msra.mxu0 %v965_v22 }
 0x18b   : > { %967 = vmatprep.subr.bf16.mxu0 %v1023_v40 }
 0x18c   : > { %v482_v6 = vpack.c.bf16 %v481_v5, %v480_v4 }
 0x18e   : > { %908 = vmatmul.mubr.bf16.vlgmr.msra.gmra.mrb[0].mxu1 %v482_v6  ;;  %969 = vmatpush3.bf16.msra.mxu0 %v968_v25 }
 0x261   : > { %v581_v28 = vpop.f32.mrb[0].mxu1 }
 0x262   : > { %v592_v29 = vmul.f32 %v591_v26, %v581_v28  ;;  %v909_v30 = vpop.f32.mrb[1].mxu1 }
 0x263   : > { %v584_v31 = vpop.f32.mrb[2].mxu1 }
 0x264   : > { %v598_v32 = vadd.f32 %v597_v27, %v592_v29  ;;  %v593_v34 = vmul.f32 %v591_v26, %v584_v31  ;;  %v910_v35 = vpop.f32.mrb[3].mxu1 }
 0x266   : > { %v599_v36 = vadd.f32 %v597_v27, %v593_v34  ;;  %v600_v37 = vmax.f32 %v598_v32, 0.0 }
 0x268   : > { %v601_v40 = vmax.f32 %v599_v36, 0.0 }
 0x26a   : > { %v602_v38 = vadd.f32 %v601_v40, %v600_v37 }
 0x26c   : > { %v603_v39 = vrot.slane %v602_v38, 4 }
 0x26e   : > { %v604_v41 = vadd.f32 %v603_v39, %v602_v38 }
 0x270   : > { %v605_v42 = vrot.slane %v604_v41, 2 }
 0x272   : > { %v606_v43 = vadd.f32 %v605_v42, %v604_v41 }
 0x274   : > { %v607_v48 = vrot.slane %v606_v43, 1 }
 0x276   : > { %v608_v44 = vadd.f32 %v607_v48, %v606_v43 }
 0x278   : > { %944 = vmatmul.mubr.f32.vlgmr.msra.gmra.mrb[4].mxu0 %v608_v44 }
 0x34b   : > { %v694_v45 = vpop.f32.mrb[4].mxu0 }
 0x34c   : > { %v695_v46 = vadd.f32 %v694_v45, %v626_v49  ;;  %v945_v33 = vpop.f32.mrb[5].mxu0 }
 0x34e   : > { %v698_v52 = vmax.f32 %v695_v46, 0.0 }
 0x350   : > { %710 = vperm.xlu1 %988, %v698_v52   ;;  %701 = vperm.xlu0 %987, %v698_v52  }
 0x354   : > { %989 = vset.pattern.permute.xlu1 %v1026_v53  ;;  %990 = vset.pattern.permute.xlu0 %v1027_v54 }
 0x355   : > { %718 = vperm.xlu1 %989, %v698_v52   ;;  %726 = vperm.xlu0 %990, %v698_v52  }
 0x3cf   : > { %v711_v58 = vpop.permute.xlu1 %710  ;;  %v702_v50 = vpop.permute.xlu0 %701 }
 0x3d0   : > { %v707_v59 = vmul.f32 %v705_v56, %v702_v50  ;;  %v715_v61 = vmul.f32 %v713_v57, %v711_v58 }
 0x3d2   : > { %v708_v62 = vadd.f32 %v707_v59, %v228_v55 }
 0x3d4   : > { %v719_v0 = vpop.permute.xlu1 %718  ;;  %v716_v2 = vadd.f32 %v715_v61, %v708_v62  ;;  %v727_v3 = vpop.permute.xlu0 %726 }
 0x3d5   : > { %v723_v1 = vmul.f32 %v721_v60, %v719_v0  ;;  %v731_v5 = vmul.f32 %v729_v63, %v727_v3 }
 0x3d7   : > { %v724_v4 = vadd.f32 %v723_v1, %v716_v2 }
 0x3d9   : > { %v732_v6 = vadd.f32 %v731_v5, %v724_v4 }
 0x3db   : > { %v831_v7 = vmul.f32 -1.442695, %v732_v6 }
 0x3dd   : > { %1007 = vpow2.f32 %v831_v7 }
 0x3e7   : > { %v1008_v47 = vpop.eup %1007 }
 0x3e8   : > { %v736_v8 = vadd.f32 1.0, %v1008_v47 }
 0x3ea   : > { %1009 = vrcp.f32 %v736_v8 }
 0x3f4   : > { %v1010_v51 = vpop.eup %1009 }
 0x3f5   : > { %v742_v9 = vrot.slane %v1010_v51, %v1120_v15 }
 0x3f7   : > { %v743_v10 = vmul.f32 %v742_v9, %v600_v37  ;;  %v744_v11 = vmul.f32 %v742_v9, %v601_v40 }
 0x3f9   : > { %745 = vst [vmem:[%s224_s6] sm:$0xff] %v743_v10  ;;  %746 = vst [vmem:[%s224_s6 + $0x8] sm:$0xff] %v744_v11 }
 0x3fa PF: > { %s15_s18 = sadd.s32 1, %s1017_s18  }
 0x3fb   : > { %p12_p4 = scmp.ge.s32.totalorder %s15_s18, 4  }
 0x3fd   :  { %14 = sbr.rel (!%p12_p4) target bundleno = 1 (0x1), region = 70 }

</bundles_post_ra>
